<compile_context>
chip_gen: v7x
topology: tpu7x:2x2x1
jax: 0.10.0
libtpu: 0.0.40
codegen_flags: <defaults>
</compile_context>

<pallas_src>
import functools
import math

import jax
import jax.numpy as jnp
from jax import lax
from jax.experimental import pallas as pl
from jax.experimental.pallas import tpu as pltpu


def _round_up(x, m):
    return ((x + m - 1) // m) * m


def _glove_kernel(x_max, alpha, batch_size, tb, inner, last_real_tile,
                  need_mask_last, full_cover,
                  # scalar-prefetch (SMEM)
                  inp_idx, out_idx,
                  # inputs
                  bco_ref, in_tab, out_tab,
                  # outputs
                  out_ref,
                  # scratch
                  buf_in, buf_out, sem, acc):
    # inp_idx / out_idx : SMEM int32 [B_pad]          gather indices
    # bco_ref           : VMEM f32  [tb, 4]           (b_in, b_out, co, 0) per row
    # in_tab / out_tab  : HBM  f32  [V, E_pad]        embedding tables (pl.ANY)
    # out_ref           : VMEM f32  [1, 8, 128]       per-slice partial sums
    # buf_in / buf_out  : VMEM f32  [2, tb, E_pad]    double-buffered gather dst
    # sem               : DMA sems  [2, 2]            [table, slot]
    # acc               : SMEM f32  [8]               5 scalar accumulators
    s = pl.program_id(0)
    i = pl.program_id(1)
    g = s * inner + i                       # global batch-tile index

    # ---------------- fused, double-buffered row gather ---------------------
    def issue_gather(tile, slot):
        base = tile * tb

        @pl.loop(0, tb)
        def _(r):
            pltpu.make_async_copy(in_tab.at[inp_idx[base + r]],
                                  buf_in.at[slot, r],
                                  sem.at[0, slot]).start()
            pltpu.make_async_copy(out_tab.at[out_idx[base + r]],
                                  buf_out.at[slot, r],
                                  sem.at[1, slot]).start()

    def wait_gather(slot):
        # One wait per issued row copy (same size); descriptor indices are dummies.
        @pl.loop(0, tb)
        def _(r):
            pltpu.make_async_copy(in_tab.at[0], buf_in.at[slot, 0],
                                  sem.at[0, slot]).wait()
            pltpu.make_async_copy(out_tab.at[0], buf_out.at[slot, 0],
                                  sem.at[1, slot]).wait()

    @pl.when(i == 0)
    def _prime_and_init():
        for k in range(5):
            acc[k] = 0.0
        issue_gather(g, 0)

    slot = lax.rem(i, 2)
    wait_gather(slot)

    if inner > 1:
        @pl.when(i + 1 < inner)
        def _prefetch_next():
            issue_gather(g + 1, 1 - slot)

    # ---------------- per-tile contribution (O(B) rewrite) ------------------
    log_x_max = math.log(x_max)

    def contribute(mask_rows):
        in_e = buf_in[slot]                                   # [tb, E_pad]
        out_e = buf_out[slot]                                 # [tb, E_pad]
        d = jnp.sum(in_e * out_e, axis=1, keepdims=True)      # [tb, 1]

        bco = bco_ref[...]                                    # [tb, 4]
        b_in = bco[:, 0:1]
        b_out = bco[:, 1:2]
        co = bco[:, 2:3]                                      # padded rows: co = 1.0

        log_co = jnp.log(co)
        w = jnp.where(co > x_max, 1.0, jnp.exp(alpha * (log_co - log_x_max)))
        a = d - log_co
        b = b_in + b_out

        if mask_rows:
            rows = (last_real_tile * tb
                    + lax.broadcasted_iota(jnp.int32, (tb, 1), 0))
            valid = (rows < batch_size).astype(jnp.float32)
            w = w * valid
            b = b * valid

        wa = w * a
        acc[0] += jnp.sum(wa * a)
        acc[1] += jnp.sum(wa)
        acc[2] += jnp.sum(w)
        acc[3] += jnp.sum(b)
        acc[4] += jnp.sum(b * b)

    if full_cover:
        contribute(False)                                     # every tile is full
    else:
        @pl.when(g < last_real_tile)
        def _full_tiles():
            contribute(False)

        if need_mask_last:
            @pl.when(g == last_real_tile)
            def _partial_tile():
                contribute(True)
        else:
            @pl.when(g == last_real_tile)
            def _last_full_tile():
                contribute(False)
        # tiles with g > last_real_tile are pure padding: skipped entirely.

    # ---------------- per-slice finalize -------------------------------------
    @pl.when(i == inner - 1)
    def _finalize():
        sub = lax.broadcasted_iota(jnp.int32, (8, 128), 0)
        vec = jnp.zeros((8, 128), jnp.float32)
        for k in range(5):
            vec = jnp.where(sub == k, acc[k], vec)
        out_ref[0] = vec


def glove_loss_pallas(in_table, out_table, bco, inp_idx, out_idx, *,
                      x_max, alpha, tb=None, num_slices=None):
    """in_table/out_table: [V, E_pad] f32 (E_pad ideally multiple of 128);
    bco: [B, 4] f32 = (b_in, b_out, co, 0); inp_idx/out_idx: [B] int32."""
    V, E_pad = in_table.shape
    B = int(inp_idx.shape[0])

    # --- tile-size selection (amortize ~0.35us/step; respect v7x 64 MiB VMEM) ---
    if tb is None:
        tb = 1024
    vmem_gather_budget = 20 * 2 ** 20          # 2 tables x 2 slots x tb x E_pad x 4B
    tb_cap = max(8, (vmem_gather_budget // (16 * E_pad)) // 8 * 8)
    tb = max(8, min(_round_up(B, 8), _round_up(int(tb), 8), tb_cap))

    n_tiles_real = -(-B // tb)
    if num_slices is None:
        num_slices = 2 if n_tiles_real >= 2 else 1   # v7x: one slice per TensorCore
    num_slices = max(1, int(num_slices))
    inner = -(-n_tiles_real // num_slices)
    total_tiles = num_slices * inner
    B_pad = total_tiles * tb
    pad = B_pad - B

    inp_idx = inp_idx.astype(jnp.int32)
    out_idx = out_idx.astype(jnp.int32)
    bco = bco.astype(jnp.float32)
    if pad:
        inp_idx = jnp.pad(inp_idx, (0, pad))                   # index 0 is safe
        out_idx = jnp.pad(out_idx, (0, pad))
        pad_row = jnp.tile(jnp.array([[0.0, 0.0, 1.0, 0.0]], jnp.float32), (pad, 1))
        bco = jnp.concatenate([bco, pad_row], axis=0)          # co=1 -> log co = 0

    last_real_tile = (B - 1) // tb
    need_mask_last = (B % tb) != 0
    full_cover = (pad == 0)

    kernel = functools.partial(_glove_kernel, float(x_max), float(alpha),
                               int(B), int(tb), int(inner), int(last_real_tile),
                               bool(need_mask_last), bool(full_cover))

    grid_spec = pltpu.PrefetchScalarGridSpec(
        num_scalar_prefetch=2,
        grid=(num_slices, inner),
        in_specs=[
            pl.BlockSpec((tb, 4), lambda s, i, inp, outp: (s * inner + i, 0)),
            pl.BlockSpec(memory_space=pl.ANY),     # in_embed table stays in HBM
            pl.BlockSpec(memory_space=pl.ANY),     # out_embed table stays in HBM
        ],
        out_specs=pl.BlockSpec((1, 8, 128), lambda s, i, inp, outp: (s, 0, 0)),
        scratch_shapes=[
            pltpu.VMEM((2, tb, E_pad), jnp.float32),   # gathered in_embed rows
            pltpu.VMEM((2, tb, E_pad), jnp.float32),   # gathered out_embed rows
            pltpu.SemaphoreType.DMA((2, 2)),           # [table, slot]
            pltpu.SMEM((8,), jnp.float32),             # 5 scalar accumulators
        ],
    )

    partials = pl.pallas_call(
        kernel,
        out_shape=jax.ShapeDtypeStruct((num_slices, 8, 128), jnp.float32),
        grid_spec=grid_spec,
        compiler_params=pltpu.CompilerParams(
            dimension_semantics=("parallel", "arbitrary"),
            vmem_limit_bytes=32 * 2 ** 20,
        ),
    )(inp_idx, out_idx, bco, in_table, out_table)

    # Combine per-slice partial sums in plain JAX (safe across TensorCores).
    sums = jnp.sum(partials[:, :5, 0], axis=0)
    s_wa2, s_wa, s_w, s_b, s_b2 = sums[0], sums[1], sums[2], sums[3], sums[4]
    return float(B) * s_wa2 + 2.0 * s_b * s_wa + s_w * s_b2


class GloVeJax:
    """Deterministic JAX re-implementation of the GloVe module parameters."""

    def __init__(self, co_oc, embed_size, x_max=100.0, alpha=0.75, key=None):
        self.embed_size = int(embed_size)
        self.embed_size_padded = _round_up(self.embed_size, 128)  # lane-dense
        self.x_max = float(x_max)
        self.alpha = float(alpha)
        # co_oc matrix is shifted to prevent log(0)
        self.co_oc = co_oc.astype(jnp.float32) + 1.0
        self.num_classes = self.co_oc.shape[0]

        key = jax.random.PRNGKey(0) if key is None else key
        k1, k2, k3, k4 = jax.random.split(key, 4)

        def xavier_normal(k, shape):
            fan_out, fan_in = shape
            std = (2.0 / (fan_in + fan_out)) ** 0.5
            return std * jax.random.normal(k, shape, dtype=jnp.float32)

        def pad_table(t):
            extra = self.embed_size_padded - self.embed_size
            return jnp.pad(t, ((0, 0), (0, extra))) if extra else t

        # Tables are padded once, at creation time (zero columns add nothing to
        # the dot product); no per-call padding of [B,E] data.
        # TODO(synk): optionally store tables as bf16 (upcast in-kernel) to halve
        # HBM gather traffic on v5e.
        self.in_embed = pad_table(xavier_normal(k1, (self.num_classes, self.embed_size)))
        self.in_bias = xavier_normal(k2, (self.num_classes, 1))
        self.out_embed = pad_table(xavier_normal(k3, (self.num_classes, self.embed_size)))
        self.out_bias = xavier_normal(k4, (self.num_classes, 1))

    def forward(self, inp, out, *, tb=None, num_slices=None):
        inp = inp.astype(jnp.int32)
        out = out.astype(jnp.int32)
        # The big [B,E] embedding gathers are fused into the kernel (manual DMA).
        # TODO(synk): the tiny per-example scalars (biases + co-occurrence entry)
        # are still gathered in plain JAX and packed into one [B,4] side input;
        # per-element DMAs for them inside the kernel would be descriptor-bound.
        co = self.co_oc[inp, out]                     # [B]
        b_in = self.in_bias[inp, 0]                   # [B]
        b_out = self.out_bias[out, 0]                 # [B]
        bco = jnp.stack([b_in, b_out, co, jnp.zeros_like(co)], axis=1)  # [B,4]
        return glove_loss_pallas(self.in_embed, self.out_embed, bco, inp, out,
                                 x_max=self.x_max, alpha=self.alpha,
                                 tb=tb, num_slices=num_slices)

    def forward_ref(self, inp, out):
        # Pure-JAX reference reproducing the PyTorch broadcasting exactly.
        co = self.co_oc[inp, out]
        w = jnp.where(co > self.x_max, 1.0, (co / self.x_max) ** self.alpha)
        in_e = self.in_embed[inp]
        out_e = self.out_embed[out]
        b_in = self.in_bias[inp]                      # [B, 1]
        b_out = self.out_bias[out]                    # [B, 1]
        d = jnp.sum(in_e * out_e, axis=1)             # [B]
        m = d[None, :] + b_in + b_out                 # [B, B]
        return jnp.sum(w[None, :] * (m - jnp.log(co)[None, :]) ** 2)


if __name__ == "__main__":
    num_classes = 64
    embed_size = 32
    batch = 20            # deliberately not a multiple of 8 -> exercises masking

    key = jax.random.PRNGKey(0)
    k_co, k_params, k_in, k_out = jax.random.split(key, 4)

    # Synthetic non-negative co-occurrence counts.
    co_oc = jax.random.uniform(k_co, (num_classes, num_classes),
                               minval=0.0, maxval=200.0)
    model = GloVeJax(co_oc, embed_size, x_max=100, alpha=0.75, key=k_params)

    inp = jax.random.randint(k_in, (batch,), 0, num_classes, dtype=jnp.int32)
    out = jax.random.randint(k_out, (batch,), 0, num_classes, dtype=jnp.int32)

    ref = jax.block_until_ready(model.forward_ref(inp, out))

    # Config A: default tile selection (single partial tile, one slice).
    loss_a = jax.block_until_ready(model.forward(inp, out))
    # Config B: small tiles -> multi-tile double-buffered gather, 2 slices,
    # one partial tile and one fully-padded tile.
    loss_b = jax.block_until_ready(model.forward(inp, out, tb=8, num_slices=2))

    for name, val in (("default", loss_a), ("tiled", loss_b)):
        assert jnp.isfinite(val), f"{name}: loss is not finite"
        assert jnp.allclose(val, ref, rtol=1e-4, atol=1e-3), (name, val, ref)
    print("KERNEL_OK")
</pallas_src>

<mosaic_0001>
module attributes {stable_mosaic.version = 11 : i64} {
  func.func @_glove_kernel(%arg0: i32, %arg1: i32, %arg2: memref<24xi32, #tpu.memory_space<smem>>, %arg3: memref<24xi32, #tpu.memory_space<smem>>, %arg4: memref<24x4xf32, #tpu.memory_space<vmem>>, %arg5: memref<64x128xf32, #tpu.memory_space<any>>, %arg6: memref<64x128xf32, #tpu.memory_space<any>>, %arg7: memref<1x8x128xf32, #tpu.memory_space<vmem>>, %arg8: memref<2x24x128xf32, #tpu.memory_space<vmem>>, %arg9: memref<2x24x128xf32, #tpu.memory_space<vmem>>, %arg10: memref<2x2x!tpu.dma_semaphore, #tpu.memory_space<semaphore_mem>>, %arg11: memref<8xf32, #tpu.memory_space<smem>>) attributes {dimension_semantics = [#tpu.dimension_semantics<parallel>, #tpu.dimension_semantics<arbitrary>], iteration_bounds = array<i64: 1, 1>, scalar_prefetch = 2 : i64, scratch_operands = 4 : i64, tpu.core_type = #tpu.core_type<tc>, window_params = [{transform_indices = @transform_0, window_bounds = array<i64: 24, 4>}, {}, {}, {transform_indices = @transform_3, window_bounds = array<i64: 1, 8, 128>}]} {
    %c1_i32 = arith.constant 1 : i32
    %0 = arith.muli %arg0, %c1_i32 : i32
    %1 = arith.addi %0, %arg1 : i32
    %c0_i32 = arith.constant 0 : i32
    %2 = arith.cmpi eq, %arg1, %c0_i32 : i32
    %3 = arith.extui %2 : i1 to i32
    %c0_i32_0 = arith.constant 0 : i32
    %4 = arith.cmpi ne, %3, %c0_i32_0 : i32
    scf.if %4 {
      %cst = arith.constant 0.000000e+00 : f32
      %c0 = arith.constant 0 : index
      %16 = memref.load %arg11[%c0] : memref<8xf32, #tpu.memory_space<smem>>
      memref.store %cst, %arg11[%c0] : memref<8xf32, #tpu.memory_space<smem>>
      %cst_9 = arith.constant 0.000000e+00 : f32
      %c1 = arith.constant 1 : index
      %17 = memref.load %arg11[%c1] : memref<8xf32, #tpu.memory_space<smem>>
      memref.store %cst_9, %arg11[%c1] : memref<8xf32, #tpu.memory_space<smem>>
      %cst_10 = arith.constant 0.000000e+00 : f32
      %c2 = arith.constant 2 : index
      %18 = memref.load %arg11[%c2] : memref<8xf32, #tpu.memory_space<smem>>
      memref.store %cst_10, %arg11[%c2] : memref<8xf32, #tpu.memory_space<smem>>
      %cst_11 = arith.constant 0.000000e+00 : f32
      %c3 = arith.constant 3 : index
      %19 = memref.load %arg11[%c3] : memref<8xf32, #tpu.memory_space<smem>>
      memref.store %cst_11, %arg11[%c3] : memref<8xf32, #tpu.memory_space<smem>>
      %cst_12 = arith.constant 0.000000e+00 : f32
      %c4 = arith.constant 4 : index
      %20 = memref.load %arg11[%c4] : memref<8xf32, #tpu.memory_space<smem>>
      memref.store %cst_12, %arg11[%c4] : memref<8xf32, #tpu.memory_space<smem>>
      %c24_i32_13 = arith.constant 24 : i32
      %21 = arith.muli %1, %c24_i32_13 : i32
      %c0_i32_14 = arith.constant 0 : i32
      %c24_i32_15 = arith.constant 24 : i32
      %22 = arith.addi %c0_i32_14, %c24_i32_15 : i32
      %c1_i32_16 = arith.constant 1 : i32
      scf.for %arg12 = %c0_i32_14 to %22 step %c1_i32_16  : i32 {
        %c1_i32_18 = arith.constant 1 : i32
        %23 = arith.muli %arg12, %c1_i32_18 : i32
        %c0_i32_19 = arith.constant 0 : i32
        %24 = arith.addi %c0_i32_19, %23 : i32
        %25 = arith.addi %21, %24 : i32
        %26 = arith.index_cast %25 : i32 to index
        %27 = memref.load %arg2[%26] : memref<24xi32, #tpu.memory_space<smem>>
        %c0_i32_20 = arith.constant 0 : i32
        %c0_i32_21 = arith.constant 0 : i32
        %c0_i32_22 = arith.constant 0 : i32
        %c0_i32_23 = arith.constant 0 : i32
        %28 = tpu.memref_slice %arg5[%27, %c0_i32_23] : memref<64x128xf32, #tpu.memory_space<any>> -> memref<1x128xf32, #tpu.memory_space<any>>
        %29 = tpu.memref_squeeze %28 : memref<1x128xf32, #tpu.memory_space<any>> -> memref<128xf32, #tpu.memory_space<any>>
        %c0_i32_24 = arith.constant 0 : i32
        %30 = tpu.memref_slice %arg8[%c0_i32_20, %24, %c0_i32_24] : memref<2x24x128xf32, #tpu.memory_space<vmem>> -> memref<1x1x128xf32, #tpu.memory_space<vmem>>
        %31 = tpu.memref_squeeze %30 : memref<1x1x128xf32, #tpu.memory_space<vmem>> -> memref<128xf32, #tpu.memory_space<vmem>>
        %32 = tpu.memref_slice %arg10[%c0_i32_21, %c0_i32_22] : memref<2x2x!tpu.dma_semaphore, #tpu.memory_space<semaphore_mem>> -> memref<1x1x!tpu.dma_semaphore, #tpu.memory_space<semaphore_mem>>
        %33 = tpu.memref_squeeze %32 : memref<1x1x!tpu.dma_semaphore, #tpu.memory_space<semaphore_mem>> -> memref<!tpu.dma_semaphore, #tpu.memory_space<semaphore_mem>>
        tpu.enqueue_dma source(%29 : memref<128xf32, #tpu.memory_space<any>>) target(%31 : memref<128xf32, #tpu.memory_space<vmem>>) target_semaphore(%33 : memref<!tpu.dma_semaphore, #tpu.memory_space<semaphore_mem>>)
        %34 = arith.addi %21, %24 : i32
        %35 = arith.index_cast %34 : i32 to index
        %36 = memref.load %arg3[%35] : memref<24xi32, #tpu.memory_space<smem>>
        %c0_i32_25 = arith.constant 0 : i32
        %c1_i32_26 = arith.constant 1 : i32
        %c0_i32_27 = arith.constant 0 : i32
        %c0_i32_28 = arith.constant 0 : i32
        %37 = tpu.memref_slice %arg6[%36, %c0_i32_28] : memref<64x128xf32, #tpu.memory_space<any>> -> memref<1x128xf32, #tpu.memory_space<any>>
        %38 = tpu.memref_squeeze %37 : memref<1x128xf32, #tpu.memory_space<any>> -> memref<128xf32, #tpu.memory_space<any>>
        %c0_i32_29 = arith.constant 0 : i32
        %39 = tpu.memref_slice %arg9[%c0_i32_25, %24, %c0_i32_29] : memref<2x24x128xf32, #tpu.memory_space<vmem>> -> memref<1x1x128xf32, #tpu.memory_space<vmem>>
        %40 = tpu.memref_squeeze %39 : memref<1x1x128xf32, #tpu.memory_space<vmem>> -> memref<128xf32, #tpu.memory_space<vmem>>
        %41 = tpu.memref_slice %arg10[%c1_i32_26, %c0_i32_27] : memref<2x2x!tpu.dma_semaphore, #tpu.memory_space<semaphore_mem>> -> memref<1x1x!tpu.dma_semaphore, #tpu.memory_space<semaphore_mem>>
        %42 = tpu.memref_squeeze %41 : memref<1x1x!tpu.dma_semaphore, #tpu.memory_space<semaphore_mem>> -> memref<!tpu.dma_semaphore, #tpu.memory_space<semaphore_mem>>
        tpu.enqueue_dma source(%38 : memref<128xf32, #tpu.memory_space<any>>) target(%40 : memref<128xf32, #tpu.memory_space<vmem>>) target_semaphore(%42 : memref<!tpu.dma_semaphore, #tpu.memory_space<semaphore_mem>>)
      }
      %c24_i32_17 = arith.constant 24 : i32
    } else {
    }
    %c2_i32 = arith.constant 2 : i32
    %5 = arith.remsi %arg1, %c2_i32 : i32
    %c0_i32_1 = arith.constant 0 : i32
    %c24_i32 = arith.constant 24 : i32
    %6 = arith.addi %c0_i32_1, %c24_i32 : i32
    %c1_i32_2 = arith.constant 1 : i32
    scf.for %arg12 = %c0_i32_1 to %6 step %c1_i32_2  : i32 {
      %c0_i32_9 = arith.constant 0 : i32
      %c0_i32_10 = arith.constant 0 : i32
      %c0_i32_11 = arith.constant 0 : i32
      %c0_i32_12 = arith.constant 0 : i32
      %16 = tpu.memref_slice %arg5[%c0_i32_9, %c0_i32_12] : memref<64x128xf32, #tpu.memory_space<any>> -> memref<1x128xf32, #tpu.memory_space<any>>
      %17 = tpu.memref_squeeze %16 : memref<1x128xf32, #tpu.memory_space<any>> -> memref<128xf32, #tpu.memory_space<any>>
      %c0_i32_13 = arith.constant 0 : i32
      %18 = tpu.memref_slice %arg8[%5, %c0_i32_10, %c0_i32_13] : memref<2x24x128xf32, #tpu.memory_space<vmem>> -> memref<1x1x128xf32, #tpu.memory_space<vmem>>
      %19 = tpu.memref_squeeze %18 : memref<1x1x128xf32, #tpu.memory_space<vmem>> -> memref<128xf32, #tpu.memory_space<vmem>>
      %20 = tpu.memref_slice %arg10[%c0_i32_11, %5] : memref<2x2x!tpu.dma_semaphore, #tpu.memory_space<semaphore_mem>> -> memref<1x1x!tpu.dma_semaphore, #tpu.memory_space<semaphore_mem>>
      %21 = tpu.memref_squeeze %20 : memref<1x1x!tpu.dma_semaphore, #tpu.memory_space<semaphore_mem>> -> memref<!tpu.dma_semaphore, #tpu.memory_space<semaphore_mem>>
      tpu.wait_dma2 semaphore(%21 : memref<!tpu.dma_semaphore, #tpu.memory_space<semaphore_mem>>) src(%17 : memref<128xf32, #tpu.memory_space<any>>) dst(%19 : memref<128xf32, #tpu.memory_space<vmem>>)
      %c0_i32_14 = arith.constant 0 : i32
      %c0_i32_15 = arith.constant 0 : i32
      %c1_i32_16 = arith.constant 1 : i32
      %c0_i32_17 = arith.constant 0 : i32
      %22 = tpu.memref_slice %arg6[%c0_i32_14, %c0_i32_17] : memref<64x128xf32, #tpu.memory_space<any>> -> memref<1x128xf32, #tpu.memory_space<any>>
      %23 = tpu.memref_squeeze %22 : memref<1x128xf32, #tpu.memory_space<any>> -> memref<128xf32, #tpu.memory_space<any>>
      %c0_i32_18 = arith.constant 0 : i32
      %24 = tpu.memref_slice %arg9[%5, %c0_i32_15, %c0_i32_18] : memref<2x24x128xf32, #tpu.memory_space<vmem>> -> memref<1x1x128xf32, #tpu.memory_space<vmem>>
      %25 = tpu.memref_squeeze %24 : memref<1x1x128xf32, #tpu.memory_space<vmem>> -> memref<128xf32, #tpu.memory_space<vmem>>
      %26 = tpu.memref_slice %arg10[%c1_i32_16, %5] : memref<2x2x!tpu.dma_semaphore, #tpu.memory_space<semaphore_mem>> -> memref<1x1x!tpu.dma_semaphore, #tpu.memory_space<semaphore_mem>>
      %27 = tpu.memref_squeeze %26 : memref<1x1x!tpu.dma_semaphore, #tpu.memory_space<semaphore_mem>> -> memref<!tpu.dma_semaphore, #tpu.memory_space<semaphore_mem>>
      tpu.wait_dma2 semaphore(%27 : memref<!tpu.dma_semaphore, #tpu.memory_space<semaphore_mem>>) src(%23 : memref<128xf32, #tpu.memory_space<any>>) dst(%25 : memref<128xf32, #tpu.memory_space<vmem>>)
    }
    %c0_i32_3 = arith.constant 0 : i32
    %7 = arith.cmpi slt, %1, %c0_i32_3 : i32
    %8 = arith.extui %7 : i1 to i32
    %c0_i32_4 = arith.constant 0 : i32
    %9 = arith.cmpi ne, %8, %c0_i32_4 : i32
    scf.if %9 {
      %16 = arith.index_cast %5 : i32 to index
      %c0 = arith.constant 0 : index
      %c0_9 = arith.constant 0 : index
      %17 = vector.load %arg8[%16, %c0, %c0_9] : memref<2x24x128xf32, #tpu.memory_space<vmem>>, vector<1x24x128xf32>
      %18 = vector.shape_cast %17 : vector<1x24x128xf32> to vector<24x128xf32>
      %19 = arith.index_cast %5 : i32 to index
      %c0_10 = arith.constant 0 : index
      %c0_11 = arith.constant 0 : index
      %20 = vector.load %arg9[%19, %c0_10, %c0_11] : memref<2x24x128xf32, #tpu.memory_space<vmem>>, vector<1x24x128xf32>
      %21 = vector.shape_cast %20 : vector<1x24x128xf32> to vector<24x128xf32>
      %22 = arith.mulf %18, %21 : vector<24x128xf32>
      %cst = arith.constant dense<0.000000e+00> : vector<24xf32>
      %23 = vector.multi_reduction <add>, %22, %cst [1] : vector<24x128xf32> to vector<24xf32>
      %24 = vector.shape_cast %23 : vector<24xf32> to vector<24x1xf32>
      %c0_12 = arith.constant 0 : index
      %c0_13 = arith.constant 0 : index
      %25 = vector.load %arg4[%c0_12, %c0_13] : memref<24x4xf32, #tpu.memory_space<vmem>>, vector<24x4xf32>
      %26 = vector.extract_strided_slice %25 {offsets = [0, 0], sizes = [24, 1], strides = [1, 1]} : vector<24x4xf32> to vector<24x1xf32>
      %27 = vector.extract_strided_slice %25 {offsets = [0, 1], sizes = [24, 1], strides = [1, 1]} : vector<24x4xf32> to vector<24x1xf32>
      %28 = vector.extract_strided_slice %25 {offsets = [0, 2], sizes = [24, 1], strides = [1, 1]} : vector<24x4xf32> to vector<24x1xf32>
      %29 = math.log %28 : vector<24x1xf32>
      %cst_14 = arith.constant 1.000000e+02 : f32
      %30 = vector.broadcast %cst_14 : f32 to vector<24x1xf32>
      %31 = arith.cmpf ogt, %28, %30 : vector<24x1xf32>
      %cst_15 = arith.constant 4.60517025 : f32
      %32 = vector.broadcast %cst_15 : f32 to vector<24x1xf32>
      %33 = arith.subf %29, %32 : vector<24x1xf32>
      %cst_16 = arith.constant 7.500000e-01 : f32
      %34 = vector.broadcast %cst_16 : f32 to vector<24x1xf32>
      %35 = arith.mulf %34, %33 : vector<24x1xf32>
      %36 = math.exp %35 : vector<24x1xf32>
      %cst_17 = arith.constant 1.000000e+00 : f32
      %37 = vector.broadcast %cst_17 : f32 to vector<24x1xf32>
      %38 = arith.select %31, %37, %36 : vector<24x1xi1>, vector<24x1xf32>
      %39 = arith.subf %24, %29 : vector<24x1xf32>
      %40 = arith.addf %26, %27 : vector<24x1xf32>
      %41 = arith.mulf %38, %39 : vector<24x1xf32>
      %c0_18 = arith.constant 0 : index
      %42 = memref.load %arg11[%c0_18] : memref<8xf32, #tpu.memory_space<smem>>
      %43 = arith.mulf %41, %39 : vector<24x1xf32>
      %44 = vector.shape_cast %43 : vector<24x1xf32> to vector<1x24x1xf32>
      %cst_19 = arith.constant dense<0.000000e+00> : vector<1xf32>
      %45 = vector.multi_reduction <add>, %44, %cst_19 [1, 2] : vector<1x24x1xf32> to vector<1xf32>
      %46 = vector.shape_cast %45 : vector<1xf32> to vector<1x1x1xf32>
      %47 = vector.extract %46[0, 0, 0] : f32 from vector<1x1x1xf32>
      %48 = arith.addf %42, %47 : f32
      %c0_20 = arith.constant 0 : index
      %49 = memref.load %arg11[%c0_20] : memref<8xf32, #tpu.memory_space<smem>>
      memref.store %48, %arg11[%c0_20] : memref<8xf32, #tpu.memory_space<smem>>
      %c1 = arith.constant 1 : index
      %50 = memref.load %arg11[%c1] : memref<8xf32, #tpu.memory_space<smem>>
      %51 = vector.shape_cast %41 : vector<24x1xf32> to vector<1x24x1xf32>
      %cst_21 = arith.constant dense<0.000000e+00> : vector<1xf32>
      %52 = vector.multi_reduction <add>, %51, %cst_21 [1, 2] : vector<1x24x1xf32> to vector<1xf32>
      %53 = vector.shape_cast %52 : vector<1xf32> to vector<1x1x1xf32>
      %54 = vector.extract %53[0, 0, 0] : f32 from vector<1x1x1xf32>
      %55 = arith.addf %50, %54 : f32
      %c1_22 = arith.constant 1 : index
      %56 = memref.load %arg11[%c1_22] : memref<8xf32, #tpu.memory_space<smem>>
      memref.store %55, %arg11[%c1_22] : memref<8xf32, #tpu.memory_space<smem>>
      %c2 = arith.constant 2 : index
      %57 = memref.load %arg11[%c2] : memref<8xf32, #tpu.memory_space<smem>>
      %58 = vector.shape_cast %38 : vector<24x1xf32> to vector<1x24x1xf32>
      %cst_23 = arith.constant dense<0.000000e+00> : vector<1xf32>
      %59 = vector.multi_reduction <add>, %58, %cst_23 [1, 2] : vector<1x24x1xf32> to vector<1xf32>
      %60 = vector.shape_cast %59 : vector<1xf32> to vector<1x1x1xf32>
      %61 = vector.extract %60[0, 0, 0] : f32 from vector<1x1x1xf32>
      %62 = arith.addf %57, %61 : f32
      %c2_24 = arith.constant 2 : index
      %63 = memref.load %arg11[%c2_24] : memref<8xf32, #tpu.memory_space<smem>>
      memref.store %62, %arg11[%c2_24] : memref<8xf32, #tpu.memory_space<smem>>
      %c3 = arith.constant 3 : index
      %64 = memref.load %arg11[%c3] : memref<8xf32, #tpu.memory_space<smem>>
      %65 = vector.shape_cast %40 : vector<24x1xf32> to vector<1x24x1xf32>
      %cst_25 = arith.constant dense<0.000000e+00> : vector<1xf32>
      %66 = vector.multi_reduction <add>, %65, %cst_25 [1, 2] : vector<1x24x1xf32> to vector<1xf32>
      %67 = vector.shape_cast %66 : vector<1xf32> to vector<1x1x1xf32>
      %68 = vector.extract %67[0, 0, 0] : f32 from vector<1x1x1xf32>
      %69 = arith.addf %64, %68 : f32
      %c3_26 = arith.constant 3 : index
      %70 = memref.load %arg11[%c3_26] : memref<8xf32, #tpu.memory_space<smem>>
      memref.store %69, %arg11[%c3_26] : memref<8xf32, #tpu.memory_space<smem>>
      %c4 = arith.constant 4 : index
      %71 = memref.load %arg11[%c4] : memref<8xf32, #tpu.memory_space<smem>>
      %72 = arith.mulf %40, %40 : vector<24x1xf32>
      %73 = vector.shape_cast %72 : vector<24x1xf32> to vector<1x24x1xf32>
      %cst_27 = arith.constant dense<0.000000e+00> : vector<1xf32>
      %74 = vector.multi_reduction <add>, %73, %cst_27 [1, 2] : vector<1x24x1xf32> to vector<1xf32>
      %75 = vector.shape_cast %74 : vector<1xf32> to vector<1x1x1xf32>
      %76 = vector.extract %75[0, 0, 0] : f32 from vector<1x1x1xf32>
      %77 = arith.addf %71, %76 : f32
      %c4_28 = arith.constant 4 : index
      %78 = memref.load %arg11[%c4_28] : memref<8xf32, #tpu.memory_space<smem>>
      memref.store %77, %arg11[%c4_28] : memref<8xf32, #tpu.memory_space<smem>>
    } else {
    }
    %c0_i32_5 = arith.constant 0 : i32
    %10 = arith.cmpi eq, %1, %c0_i32_5 : i32
    %11 = arith.extui %10 : i1 to i32
    %c0_i32_6 = arith.constant 0 : i32
    %12 = arith.cmpi ne, %11, %c0_i32_6 : i32
    scf.if %12 {
      %16 = arith.index_cast %5 : i32 to index
      %c0 = arith.constant 0 : index
      %c0_9 = arith.constant 0 : index
      %17 = vector.load %arg8[%16, %c0, %c0_9] : memref<2x24x128xf32, #tpu.memory_space<vmem>>, vector<1x24x128xf32>
      %18 = vector.shape_cast %17 : vector<1x24x128xf32> to vector<24x128xf32>
      %19 = arith.index_cast %5 : i32 to index
      %c0_10 = arith.constant 0 : index
      %c0_11 = arith.constant 0 : index
      %20 = vector.load %arg9[%19, %c0_10, %c0_11] : memref<2x24x128xf32, #tpu.memory_space<vmem>>, vector<1x24x128xf32>
      %21 = vector.shape_cast %20 : vector<1x24x128xf32> to vector<24x128xf32>
      %22 = arith.mulf %18, %21 : vector<24x128xf32>
      %cst = arith.constant dense<0.000000e+00> : vector<24xf32>
      %23 = vector.multi_reduction <add>, %22, %cst [1] : vector<24x128xf32> to vector<24xf32>
      %24 = vector.shape_cast %23 : vector<24xf32> to vector<24x1xf32>
      %c0_12 = arith.constant 0 : index
      %c0_13 = arith.constant 0 : index
      %25 = vector.load %arg4[%c0_12, %c0_13] : memref<24x4xf32, #tpu.memory_space<vmem>>, vector<24x4xf32>
      %26 = vector.extract_strided_slice %25 {offsets = [0, 0], sizes = [24, 1], strides = [1, 1]} : vector<24x4xf32> to vector<24x1xf32>
      %27 = vector.extract_strided_slice %25 {offsets = [0, 1], sizes = [24, 1], strides = [1, 1]} : vector<24x4xf32> to vector<24x1xf32>
      %28 = vector.extract_strided_slice %25 {offsets = [0, 2], sizes = [24, 1], strides = [1, 1]} : vector<24x4xf32> to vector<24x1xf32>
      %29 = math.log %28 : vector<24x1xf32>
      %cst_14 = arith.constant 1.000000e+02 : f32
      %30 = vector.broadcast %cst_14 : f32 to vector<24x1xf32>
      %31 = arith.cmpf ogt, %28, %30 : vector<24x1xf32>
      %cst_15 = arith.constant 4.60517025 : f32
      %32 = vector.broadcast %cst_15 : f32 to vector<24x1xf32>
      %33 = arith.subf %29, %32 : vector<24x1xf32>
      %cst_16 = arith.constant 7.500000e-01 : f32
      %34 = vector.broadcast %cst_16 : f32 to vector<24x1xf32>
      %35 = arith.mulf %34, %33 : vector<24x1xf32>
      %36 = math.exp %35 : vector<24x1xf32>
      %cst_17 = arith.constant 1.000000e+00 : f32
      %37 = vector.broadcast %cst_17 : f32 to vector<24x1xf32>
      %38 = arith.select %31, %37, %36 : vector<24x1xi1>, vector<24x1xf32>
      %39 = arith.subf %24, %29 : vector<24x1xf32>
      %40 = arith.addf %26, %27 : vector<24x1xf32>
      %41 = tpu.iota {dimensions = array<i32: 0>} : vector<24x1xi32>
      %c0_i32_18 = arith.constant 0 : i32
      %42 = vector.broadcast %c0_i32_18 : i32 to vector<24x1xi32>
      %43 = arith.addi %42, %41 : vector<24x1xi32>
      %c20_i32 = arith.constant 20 : i32
      %44 = vector.broadcast %c20_i32 : i32 to vector<24x1xi32>
      %45 = arith.cmpi slt, %43, %44 : vector<24x1xi32>
      %46 = arith.extui %45 : vector<24x1xi1> to vector<24x1xi32>
      %47 = arith.sitofp %46 : vector<24x1xi32> to vector<24x1xf32>
      %48 = arith.mulf %38, %47 : vector<24x1xf32>
      %49 = arith.mulf %40, %47 : vector<24x1xf32>
      %50 = arith.mulf %48, %39 : vector<24x1xf32>
      %c0_19 = arith.constant 0 : index
      %51 = memref.load %arg11[%c0_19] : memref<8xf32, #tpu.memory_space<smem>>
      %52 = arith.mulf %50, %39 : vector<24x1xf32>
      %53 = vector.shape_cast %52 : vector<24x1xf32> to vector<1x24x1xf32>
      %cst_20 = arith.constant dense<0.000000e+00> : vector<1xf32>
      %54 = vector.multi_reduction <add>, %53, %cst_20 [1, 2] : vector<1x24x1xf32> to vector<1xf32>
      %55 = vector.shape_cast %54 : vector<1xf32> to vector<1x1x1xf32>
      %56 = vector.extract %55[0, 0, 0] : f32 from vector<1x1x1xf32>
      %57 = arith.addf %51, %56 : f32
      %c0_21 = arith.constant 0 : index
      %58 = memref.load %arg11[%c0_21] : memref<8xf32, #tpu.memory_space<smem>>
      memref.store %57, %arg11[%c0_21] : memref<8xf32, #tpu.memory_space<smem>>
      %c1 = arith.constant 1 : index
      %59 = memref.load %arg11[%c1] : memref<8xf32, #tpu.memory_space<smem>>
      %60 = vector.shape_cast %50 : vector<24x1xf32> to vector<1x24x1xf32>
      %cst_22 = arith.constant dense<0.000000e+00> : vector<1xf32>
      %61 = vector.multi_reduction <add>, %60, %cst_22 [1, 2] : vector<1x24x1xf32> to vector<1xf32>
      %62 = vector.shape_cast %61 : vector<1xf32> to vector<1x1x1xf32>
      %63 = vector.extract %62[0, 0, 0] : f32 from vector<1x1x1xf32>
      %64 = arith.addf %59, %63 : f32
      %c1_23 = arith.constant 1 : index
      %65 = memref.load %arg11[%c1_23] : memref<8xf32, #tpu.memory_space<smem>>
      memref.store %64, %arg11[%c1_23] : memref<8xf32, #tpu.memory_space<smem>>
      %c2 = arith.constant 2 : index
      %66 = memref.load %arg11[%c2] : memref<8xf32, #tpu.memory_space<smem>>
      %67 = vector.shape_cast %48 : vector<24x1xf32> to vector<1x24x1xf32>
      %cst_24 = arith.constant dense<0.000000e+00> : vector<1xf32>
      %68 = vector.multi_reduction <add>, %67, %cst_24 [1, 2] : vector<1x24x1xf32> to vector<1xf32>
      %69 = vector.shape_cast %68 : vector<1xf32> to vector<1x1x1xf32>
      %70 = vector.extract %69[0, 0, 0] : f32 from vector<1x1x1xf32>
      %71 = arith.addf %66, %70 : f32
      %c2_25 = arith.constant 2 : index
      %72 = memref.load %arg11[%c2_25] : memref<8xf32, #tpu.memory_space<smem>>
      memref.store %71, %arg11[%c2_25] : memref<8xf32, #tpu.memory_space<smem>>
      %c3 = arith.constant 3 : index
      %73 = memref.load %arg11[%c3] : memref<8xf32, #tpu.memory_space<smem>>
      %74 = vector.shape_cast %49 : vector<24x1xf32> to vector<1x24x1xf32>
      %cst_26 = arith.constant dense<0.000000e+00> : vector<1xf32>
      %75 = vector.multi_reduction <add>, %74, %cst_26 [1, 2] : vector<1x24x1xf32> to vector<1xf32>
      %76 = vector.shape_cast %75 : vector<1xf32> to vector<1x1x1xf32>
      %77 = vector.extract %76[0, 0, 0] : f32 from vector<1x1x1xf32>
      %78 = arith.addf %73, %77 : f32
      %c3_27 = arith.constant 3 : index
      %79 = memref.load %arg11[%c3_27] : memref<8xf32, #tpu.memory_space<smem>>
      memref.store %78, %arg11[%c3_27] : memref<8xf32, #tpu.memory_space<smem>>
      %c4 = arith.constant 4 : index
      %80 = memref.load %arg11[%c4] : memref<8xf32, #tpu.memory_space<smem>>
      %81 = arith.mulf %49, %49 : vector<24x1xf32>
      %82 = vector.shape_cast %81 : vector<24x1xf32> to vector<1x24x1xf32>
      %cst_28 = arith.constant dense<0.000000e+00> : vector<1xf32>
      %83 = vector.multi_reduction <add>, %82, %cst_28 [1, 2] : vector<1x24x1xf32> to vector<1xf32>
      %84 = vector.shape_cast %83 : vector<1xf32> to vector<1x1x1xf32>
      %85 = vector.extract %84[0, 0, 0] : f32 from vector<1x1x1xf32>
      %86 = arith.addf %80, %85 : f32
      %c4_29 = arith.constant 4 : index
      %87 = memref.load %arg11[%c4_29] : memref<8xf32, #tpu.memory_space<smem>>
      memref.store %86, %arg11[%c4_29] : memref<8xf32, #tpu.memory_space<smem>>
    } else {
    }
    %c0_i32_7 = arith.constant 0 : i32
    %13 = arith.cmpi eq, %arg1, %c0_i32_7 : i32
    %14 = arith.extui %13 : i1 to i32
    %c0_i32_8 = arith.constant 0 : i32
    %15 = arith.cmpi ne, %14, %c0_i32_8 : i32
    scf.if %15 {
      %16 = tpu.iota {dimensions = array<i32: 0>} : vector<8x128xi32>
      %cst = arith.constant 0.000000e+00 : f32
      %17 = vector.broadcast %cst : f32 to vector<8x128xf32>
      %c0_i32_9 = arith.constant 0 : i32
      %18 = vector.broadcast %c0_i32_9 : i32 to vector<8x128xi32>
      %19 = arith.cmpi eq, %16, %18 : vector<8x128xi32>
      %c0 = arith.constant 0 : index
      %20 = memref.load %arg11[%c0] : memref<8xf32, #tpu.memory_space<smem>>
      %21 = vector.broadcast %20 : f32 to vector<8x128xf32>
      %22 = arith.select %19, %21, %17 : vector<8x128xi1>, vector<8x128xf32>
      %c1_i32_10 = arith.constant 1 : i32
      %23 = vector.broadcast %c1_i32_10 : i32 to vector<8x128xi32>
      %24 = arith.cmpi eq, %16, %23 : vector<8x128xi32>
      %c1 = arith.constant 1 : index
      %25 = memref.load %arg11[%c1] : memref<8xf32, #tpu.memory_space<smem>>
      %26 = vector.broadcast %25 : f32 to vector<8x128xf32>
      %27 = arith.select %24, %26, %22 : vector<8x128xi1>, vector<8x128xf32>
      %c2_i32_11 = arith.constant 2 : i32
      %28 = vector.broadcast %c2_i32_11 : i32 to vector<8x128xi32>
      %29 = arith.cmpi eq, %16, %28 : vector<8x128xi32>
      %c2 = arith.constant 2 : index
      %30 = memref.load %arg11[%c2] : memref<8xf32, #tpu.memory_space<smem>>
      %31 = vector.broadcast %30 : f32 to vector<8x128xf32>
      %32 = arith.select %29, %31, %27 : vector<8x128xi1>, vector<8x128xf32>
      %c3_i32 = arith.constant 3 : i32
      %33 = vector.broadcast %c3_i32 : i32 to vector<8x128xi32>
      %34 = arith.cmpi eq, %16, %33 : vector<8x128xi32>
      %c3 = arith.constant 3 : index
      %35 = memref.load %arg11[%c3] : memref<8xf32, #tpu.memory_space<smem>>
      %36 = vector.broadcast %35 : f32 to vector<8x128xf32>
      %37 = arith.select %34, %36, %32 : vector<8x128xi1>, vector<8x128xf32>
      %c4_i32 = arith.constant 4 : i32
      %38 = vector.broadcast %c4_i32 : i32 to vector<8x128xi32>
      %39 = arith.cmpi eq, %16, %38 : vector<8x128xi32>
      %c4 = arith.constant 4 : index
      %40 = memref.load %arg11[%c4] : memref<8xf32, #tpu.memory_space<smem>>
      %41 = vector.broadcast %40 : f32 to vector<8x128xf32>
      %42 = arith.select %39, %41, %37 : vector<8x128xi1>, vector<8x128xf32>
      %c0_12 = arith.constant 0 : index
      %c0_13 = arith.constant 0 : index
      %c0_14 = arith.constant 0 : index
      %43 = vector.load %arg7[%c0_12, %c0_13, %c0_14] : memref<1x8x128xf32, #tpu.memory_space<vmem>>, vector<1x8x128xf32>
      %44 = vector.shape_cast %43 : vector<1x8x128xf32> to vector<8x128xf32>
      %45 = vector.shape_cast %42 : vector<8x128xf32> to vector<1x8x128xf32>
      tpu.vector_store %arg7[%c0_12, %c0_13, %c0_14], %45 {strides = array<i32>} : memref<1x8x128xf32, #tpu.memory_space<vmem>>, vector<1x8x128xf32>,
    } else {
    }
    return
  }
  func.func @transform_0(%arg0: i32, %arg1: i32, %arg2: memref<24xi32, #tpu.memory_space<smem>>, %arg3: memref<24xi32, #tpu.memory_space<smem>>) -> (i32, i32) {
    %c1_i32 = arith.constant 1 : i32
    %0 = arith.muli %arg0, %c1_i32 : i32
    %1 = arith.addi %0, %arg1 : i32
    %c0_i32 = arith.constant 0 : i32
    %c0_i32_0 = arith.constant 0 : i32
    return %1, %c0_i32 : i32, i32
  }
  func.func @transform_3(%arg0: i32, %arg1: i32, %arg2: memref<24xi32, #tpu.memory_space<smem>>, %arg3: memref<24xi32, #tpu.memory_space<smem>>) -> (i32, i32, i32) {
    %c0_i32 = arith.constant 0 : i32
    %c0_i32_0 = arith.constant 0 : i32
    %c0_i32_1 = arith.constant 0 : i32
    return %arg0, %c0_i32, %c0_i32_0 : i32, i32, i32
  }
}

</mosaic_0001>

<bundles_post_ra>
// kernel: tpu_custom_call.1
= control target key start
LH: loop header
LB: loop body
LE: loop exit
PB: predicated region body
PF: predicated region fallthrough
CT: control target
= control target key end

     0   :  { %s965_s0 = inlined_call_operand.vmem [shape: s32[24], index: 0, kind: input, shape index: {}]   ;;  %s966_s2 = inlined_call_operand.vmem [shape: f32[24,4], index: 2, kind: input, shape index: {}]   ;;  %s967_s3 = inlined_call_operand.hbm [shape: f32[64,128], index: 3, kind: input, shape index: {}]   ;;  %s968_s4 = inlined_call_operand.hbm [shape: f32[64,128], index: 4, kind: input, shape index: {}]   ;;  %s969_s5 = inlined_call_operand.hbm [shape: f32[1,8,128], index: 5, kind: output, shape index: {}]   ;;  %s970_s1 = inlined_call_operand.vmem [shape: s32[24], index: 1, kind: input, shape index: {}]  }
   0x1   :  { %s10_s20 = sshll.u32 %s965_s0, 4  ;;  %s14_s23 = sshll.u32 %s970_s1, 4  ;;  %s11_s20 = int_to_ptr.vmem [resolvable:$true] %s10_s20  ;;  %s15_s23 = int_to_ptr.vmem [resolvable:$true] %s14_s23 }
   0x2   :  { %s698_s24 = scalar_lea.vmem %s11_s20, 16  ;;  %p703_p1 = scmp.lt.s32.totalorder %s11_s20, %s11_s20 }
   0x3   :  { %p699_p0 = scmp.ne.s32.totalorder %s11_s20, %s698_s24  ;;  %p704_p2 = scmp.lt.s32.totalorder %s698_s24, %s698_s24 }
   0x5   :  { %p705_p3 = por %p704_p2, %p703_p1 }
   0x7   :  { %p706_p4 = pnand %p705_p3, %p699_p0 }
   0x9   :  { %709 = shalt.err (!%p706_p4)  }
   0xa   :  { %s816_s25 = smov [#allocation7]   ;;  %s710_s26 = scalar_lea.vmem %s15_s23, 16 }
   0xb   :  { %13 = dma.vmem_to_smem %s11_s20, 16, %s816_s25, [#allocation6] }
   0xc   :  { %p711_p5 = scmp.ne.s32.totalorder %s15_s23, %s710_s26  ;;  %p715_p6 = scmp.lt.s32.totalorder %s15_s23, %s15_s23 }
   0xd   :  { %p716_p7 = scmp.lt.s32.totalorder %s710_s26, %s710_s26 }
   0xf   :  { %p717_p8 = por %p716_p7, %p715_p6 }
  0x11   :  { %p718_p9 = pnand %p717_p8, %p711_p5 }
  0x13   :  { %721 = shalt.err (!%p718_p9)  }
  0x14   :  { %s817_s0 = smov [#allocation8]  }
  0x15   :  { %17 = dma.vmem_to_smem %s15_s23, 16, %s817_s0, [#allocation6] }
  0x16   :  { %800 = dma.done.wait [#allocation6], 32 }
  0x17   :  { %801 = vsyncadd [#allocation6], 4294967264 }
  0x18   :  { %19 = sfence }
  0x19   :  { %20 = vsyncpa [#allocation10], 0  ;;  %s818_s1 = smov 0.0   ;;  %s861_s27 = smov 0  }
  0x1a   :  { %51 = sst [smem:[#allocation5]] %s818_s1 }
  0x1b   :  { %53 = sst [smem:[#allocation5 + $0x1]] %s818_s1 }
  0x1c   :  { %55 = sst [smem:[#allocation5 + $0x2]] %s818_s1 }
  0x1d   :  { %57 = sst [smem:[#allocation5 + $0x3]] %s818_s1 }
  0x1e   :  { %59 = sst [smem:[#allocation5 + $0x4]] %s818_s1 }
  0x1f LB: > { %s68_s28 = sld [smem:[#allocation7 + %s810_s27]]  ;;  %s71_s30 = scalar_lea.vmem [#allocation2], %s810_s27  ;;  %s810_s27 = sphi %s861_s27, %s66_s27  }
  0x20   : > { %s868_s29 = sld [smem:[#allocation8 + %s810_s27]]  ;;  %s79_s6 = sshll.u32 %s71_s30, 4  ;;  %s80_s6 = int_to_ptr.vmem [resolvable:$true] %s79_s6 }
  0x21   : > { %s86_s7 = scalar_lea.vmem [#allocation3], %s810_s27  ;;  %s724_s17 = scalar_lea.hbm %s967_s3, 1024 }
  0x22   : > { %s95_s8 = sshll.u32 %s86_s7, 4  ;;  %s872_s8 = int_to_ptr.vmem [resolvable:$true] %s95_s8 }
  0x25   : > { %s628_s9 = sshll.u32 %s68_s28, 4 }
  0x26   : > { %s70_s12 = scalar_lea.hbm %s967_s3, %s628_s9  ;;  %s629_s13 = sshll.u32 %s868_s29, 4 }
  0x27   : > { %s722_s14 = scalar_lea.hbm %s70_s12, 16  ;;  %p725_p11 = scmp.lt.u32.totalorder %s70_s12, %s967_s3 }
  0x28   : > { %p723_p10 = scmp.ne.s32.totalorder %s70_s12, %s722_s14  ;;  %p726_p12 = scmp.lt.u32.totalorder %s724_s17, %s722_s14 }
  0x29   : > { %p728_p0 = scmp.lt.u32.totalorder %s722_s14, %s70_s12 }
  0x2a   : > { %p727_p13 = por %p726_p12, %p725_p11 }
  0x2c   : > { %p729_p1 = por %p728_p0, %p727_p13 }
  0x2e   : > { %p730_p2 = pnand %p729_p1, %p723_p10 }
  0x30   : > { %733 = shalt.err (!%p730_p2)  }
  0x31   : > { %s734_s20 = scalar_lea.vmem %s80_s6, 16  ;;  %s819_s21 = smov [#allocation2]  }
  0x32   : > { %p735_p3 = scmp.ne.s32.totalorder %s80_s6, %s734_s20  ;;  %s736_s22 = sshll.u32 %s819_s21, 4  ;;  %s737_s22 = int_to_ptr.vmem [resolvable:$false] %s736_s22 }
  0x33   : > { %s738_s23 = scalar_lea.vmem %s737_s22, 768  ;;  %p739_p4 = scmp.lt.s32.totalorder %s80_s6, %s737_s22 }
  0x34   : > { %p740_p5 = scmp.lt.s32.totalorder %s738_s23, %s734_s20 }
  0x36   : > { %p741_p6 = por %p740_p5, %p739_p4 }
  0x38   : > { %p742_p7 = pnand %p741_p6, %p735_p3 }
  0x3a   : > { %745 = shalt.err (!%p742_p7)  }
  0x3b   : > { %82 = dma.hbm_to_vmem [thread:$0]  %s70_s12, 16, %s80_s6, [#allocation4] }
  0x3c   : > { %s85_s26 = scalar_lea.hbm %s968_s4, %s629_s13  ;;  %s748_s29 = scalar_lea.hbm %s968_s4, 1024 }
  0x3d   : > { %s746_s0 = scalar_lea.hbm %s85_s26, 16  ;;  %p749_p9 = scmp.lt.u32.totalorder %s85_s26, %s968_s4 }
  0x3e   : > { %p747_p8 = scmp.ne.s32.totalorder %s85_s26, %s746_s0  ;;  %p750_p10 = scmp.lt.u32.totalorder %s748_s29, %s746_s0 }
  0x3f   : > { %p752_p12 = scmp.lt.u32.totalorder %s746_s0, %s85_s26 }
  0x40   : > { %p751_p11 = por %p750_p10, %p749_p9 }
  0x42   : > { %p753_p13 = por %p752_p12, %p751_p11 }
  0x44   : > { %p754_p0 = pnand %p753_p13, %p747_p8 }
  0x46   : > { %757 = shalt.err (!%p754_p0)  }
  0x47   : > { %s758_s6 = scalar_lea.vmem %s872_s8, 16  ;;  %s820_s9 = smov [#allocation3]  }
  0x48   : > { %p759_p1 = scmp.ne.s32.totalorder %s872_s8, %s758_s6  ;;  %s760_s10 = sshll.u32 %s820_s9, 4  ;;  %s761_s10 = int_to_ptr.vmem [resolvable:$false] %s760_s10 }
  0x49   : > { %s762_s11 = scalar_lea.vmem %s761_s10, 768  ;;  %p763_p2 = scmp.lt.s32.totalorder %s872_s8, %s761_s10 }
  0x4a   : > { %p764_p3 = scmp.lt.s32.totalorder %s762_s11, %s758_s6 }
  0x4c   : > { %p765_p4 = por %p764_p3, %p763_p2 }
  0x4e   : > { %p766_p5 = pnand %p765_p4, %p759_p1 }
  0x50   : > { %769 = shalt.err (!%p766_p5)  }
  0x51   : > { %98 = dma.hbm_to_vmem [thread:$0]  %s85_s26, 16, %s872_s8, [#allocation4 + $0x2] }
  0x52   : > { %s66_s27 = sadd.s32 1, %s810_s27  }
  0x53   : > { %p63_p6 = scmp.ge.s32.totalorder %s66_s27, 24  }
  0x54   :  { %s812_s12 = smov (%p63_p6), 0  }
  0x55   :  { %65 = sbr.rel (!%p63_p6) target bundleno = 31 (0x1f), region = 93 }
  0x5c LB: > { %802 = dma.done.wait [#allocation4], 16  ;;  %s814_s12 = sphi %s812_s12, %s106_s12  }
  0x5d   : > { %803 = vsyncadd [#allocation4], 4294967280 }
  0x5e   : > { %804 = dma.done.wait [#allocation4 + $0x2], 16 }
  0x5f   : > { %805 = vsyncadd [#allocation4 + $0x2], 4294967280  ;;  %s106_s12 = sadd.s32 1, %s814_s12  }
  0x60   : > { %p103_p7 = scmp.ge.s32.totalorder %s106_s12, 24  }
  0x61   :  { %v322_v0 = vld [vmem:[#allocation2] sm:$0xff] (%p103_p7)  ;;  %v326_v1 = vld [vmem:[#allocation3] sm:$0xff] (%p103_p7)  ;;  %v323_v5 = vld [vmem:[#allocation2 + $0x8] sm:$0xff] (%p103_p7)  ;;  %s821_s13 = smov (%p103_p7), 127   ;;  %s822_s16 = smov (%p103_p7), 126   ;;  %v383_v31 = vlaneseq (%p103_p7)  ;;  %v823_v36 = vmov (%p103_p7), 0.0  }
  0x62   :  { %105 = sbr.rel (!%p103_p7) target bundleno = 92 (0x5c), region = 104  ;;  %v324_v2 = vld [vmem:[#allocation2 + $0x10] sm:$0xff] (%p103_p7)  ;;  %v329_v3 = vmul.f32 (%p103_p7), %v326_v1, %v322_v0  ;;  %v328_v4 = vld [vmem:[#allocation3 + $0x10] sm:$0xff] (%p103_p7)  ;;  %v327_v6 = vld [vmem:[#allocation3 + $0x8] sm:$0xff] (%p103_p7)  ;;  %vm421_vm4 = vcmask (%p103_p7), 7168   ;;  %s641_s17 = sld [smem:[#allocation5 + $0x1]] (%p103_p7) }
  0x63   :  { %v331_v7 = vmul.f32 (%p103_p7), %v328_v4, %v324_v2  ;;  %v903_v8 = vld [vmem:[%s966_s2] sm:$0xff] (%p103_p7)  ;;  %v908_v9 = vld [vmem:[%s966_s2 + $0x8] sm:$0xff] (%p103_p7)  ;;  %v330_v10 = vmul.f32 (%p103_p7), %v327_v6, %v323_v5  ;;  %v340_v21 = vld [vmem:[%s966_s2 + $0x10] sm:$0xff] (%p103_p7)  ;;  %v921_v32 = vshrl.u32 (%p103_p7), %v383_v31, 7  ;;  %s405_s2 = sld [smem:[#allocation5]] (%p103_p7)  ;;  %s642_s18 = sld [smem:[#allocation5 + $0x2]] (%p103_p7) }
  0x64   :  { %332 = vadd.xlane.f32.xlu0 (%p103_p7), %v329_v3  ;;  %686 = vlog2.f32 (%p103_p7), %v908_v9  ;;  %vm348_vm0 = vcmp.gt.f32.partialorder (%p103_p7), %v908_v9, 100.0  ;;  %vm347_vm1 = vcmp.gt.f32.partialorder (%p103_p7), %v903_v8, 100.0  ;;  %vm349_vm2 = vcmp.gt.f32.partialorder (%p103_p7), %v340_v21, 100.0  ;;  %s643_s20 = sld [smem:[#allocation5 + $0x3]] (%p103_p7)  ;;  %s644_s22 = sld [smem:[#allocation5 + $0x4]] (%p103_p7) }
  0x65   :  { %336 = vadd.xlane.f32.xlu1 (%p103_p7), %v331_v7  ;;  %688 = vlog2.f32 (%p103_p7), %v903_v8  ;;  %v386_v33 = vadd.s32 (%p103_p7), 16, %v921_v32  ;;  %vm543_vm5 = vcmp.eq.s32.totalorder (%p103_p7), %v921_v32, 0  ;;  %vm547_vm6 = vcmp.eq.s32.totalorder (%p103_p7), %v921_v32, 1  ;;  %s824_s29 = smov (%p103_p7), [#allocation9]  }
  0x66   :  { %vm551_vm7 = vcmp.eq.s32.totalorder (%p103_p7), %v921_v32, 2  ;;  %vm555_vm8 = vcmp.eq.s32.totalorder (%p103_p7), %v921_v32, 3  ;;  %s570_s30 = sshll.u32 (%p103_p7), %s824_s29, 4  ;;  %vm559_vm9 = vcmp.eq.s32.totalorder (%p103_p7), %v921_v32, 4  ;;  %s571_s30 = int_to_ptr.vmem [resolvable:$true] %s570_s30 }
  0x67   :  { %vm389_vm3 = vcmp.lt.s32.totalorder (%p103_p7), %v386_v33, 20  ;;  %s770_s6 = scalar_lea.vmem (%p103_p7), %s571_s30, 128  ;;  %p775_p9 = scmp.lt.s32.totalorder (%p103_p7), %s571_s30, %s571_s30 }
  0x68   :  { %334 = vadd.xlane.f32.xlu0 (%p103_p7), %v330_v10  ;;  %v640_v37 = vsel (%p103_p7), %vm389_vm3, 1.0, %v823_v36  ;;  %p771_p8 = scmp.ne.s32.totalorder (%p103_p7), %s571_s30, %s770_s6  ;;  %p776_p10 = scmp.lt.s32.totalorder (%p103_p7), %s770_s6, %s770_s6 }
  0x6a   :  { %p777_p11 = por %p776_p10, %p775_p9 }
  0x6c   :  { %p778_p12 = pnand %p777_p11, %p771_p8 }
  0x6e   :  { %v687_v11 = vpop.eup %686 }
  0x6f   :  { %v689_v12 = vpop.eup %688  ;;  %v344_v13 = vmul.f32 0.6931472, %v687_v11 }
  0x70   :  { %v342_v14 = vmul.f32 0.6931472, %v689_v12 }
  0x71   :  { %v638_v15 = vadd.f32 -4.6051702, %v344_v13 }
  0x72   :  { %v637_v16 = vadd.f32 -4.6051702, %v342_v14 }
  0x73   :  { %v354_v17 = vmul.f32 0.75, %v638_v15 }
  0x74   :  { %v353_v18 = vmul.f32 0.75, %v637_v16 }
  0x75   :  { %v358_v19 = vmul.f32 1.442695, %v354_v17 }
  0x76   :  { %371 = vrot.lane.b32.xlu1 %v903_v8, %s821_s13  ;;  %v356_v20 = vmul.f32 1.442695, %v353_v18 }
  0x77   :  { %690 = vpow2.f32 %v358_v19 }
  0x78   :  { %692 = vpow2.f32 %v356_v20 }
  0x79   :  { %694 = vlog2.f32 %v340_v21 }
  0x7a   :  { %375 = vrot.lane.b32.xlu1 %v340_v21, %s821_s13 }
  0x7e   :  { %373 = vrot.lane.b32.xlu0 %v908_v9, %s821_s13 }
  0x81   :  { %v691_v22 = vpop.eup %690 }
  0x82   :  { %v693_v23 = vpop.eup %692  ;;  %v363_v24 = vsel %vm348_vm0, 1.0, %v691_v22 }
  0x83   :  { %475 = vrot.lane.b32.xlu0 %v363_v24, %s822_s16  ;;  %v362_v25 = vsel %vm347_vm1, 1.0, %v693_v23  ;;  %v695_v26 = vpop.eup %694 }
  0x84   :  { %473 = vrot.lane.b32.xlu1 %v362_v25, %s822_s16  ;;  %v346_v27 = vmul.f32 0.6931472, %v695_v26 }
  0x86   :  { %v639_v28 = vadd.f32 -4.6051702, %v346_v27 }
  0x88   :  { %v355_v29 = vmul.f32 0.75, %v639_v28 }
  0x8a   :  { %v360_v30 = vmul.f32 1.442695, %v355_v29 }
  0x8c   :  { %696 = vpow2.f32 %v360_v30 }
  0x96   :  { %v697_v34 = vpop.eup %696 }
  0x97   :  { %v364_v35 = vsel %vm349_vm2, 1.0, %v697_v34 }
  0x98   :  { %v398_v39 = vmul.f32 %v640_v37, %v364_v35 }
  0xf1   :  { %v333_v38 = vpop.xlane.xlu0 %332 }
  0xf2   :  { %v365_v40 = vsub.f32 %v333_v38, %v342_v14  ;;  %v337_v41 = vpop.xlane.xlu1 %336 }
  0xf3   :  { %v367_v42 = vsub.f32 %v337_v41, %v346_v27 }
  0xf4   :  { %v402_v43 = vmul.f32 %v365_v40, %v362_v25 }
  0xf5   :  { %v404_v44 = vmul.f32 %v398_v39, %v367_v42  ;;  %v335_v45 = vpop.xlane.xlu0 %334 }
  0xf6   :  { %v366_v46 = vsub.f32 %v335_v45, %v344_v13  ;;  %443 = vrot.lane.b32.xlu0 %v402_v43, %s822_s16  ;;  %v406_v49 = vmul.f32 %v402_v43, %v365_v40  ;;  %v372_v51 = vpop.permute.xlu1 %371 }
  0xf7   :  { %v408_v47 = vmul.f32 %v404_v44, %v367_v42  ;;  %v380_v57 = vadd.f32 %v372_v51, %v903_v8 }
  0xf8   :  { %v403_v48 = vmul.f32 %v366_v46, %v363_v24 }
  0xf9   :  { %v374_v52 = vpop.permute.xlu0 %373  ;;  %v518_v0 = vmul.f32 %v380_v57, %v380_v57  ;;  %v500_v16 = vsel %vm421_vm4, %v380_v57, 0.0 }
  0xfa   :  { %416 = vrot.lane.b32.xlu0 %v408_v47, %s822_s16  ;;  %445 = vrot.lane.b32.xlu1 %v403_v48, %s822_s16  ;;  %v407_v50 = vmul.f32 %v403_v48, %v366_v46  ;;  %v376_v53 = vpop.permute.xlu1 %375  ;;  %v381_v58 = vadd.f32 %v374_v52, %v908_v9 }
  0xfb   :  { %v382_v61 = vadd.f32 %v376_v53, %v340_v21  ;;  %v521_v8 = vsel %vm421_vm4, %v518_v0, 0.0 }
  0xfc   :  { %v519_v1 = vmul.f32 %v381_v58, %v381_v58  ;;  %v501_v17 = vsel %vm421_vm4, %v381_v58, 0.0 }
  0xfd   :  { %v476_v54 = vpop.permute.xlu0 %475  ;;  %v401_v5 = vmul.f32 %v640_v37, %v382_v61  ;;  %v502_v27 = vadd.f32 %v501_v17, %v500_v16 }
  0xfe   :  { %477 = vrot.lane.b32.xlu0 %v398_v39, %s822_s16  ;;  %412 = vrot.lane.b32.xlu1 %v406_v49, %s822_s16  ;;  %v474_v55 = vpop.permute.xlu1 %473  ;;  %v483_v62 = vsel %vm421_vm4, %v476_v54, 0.0  ;;  %v522_v9 = vsel %vm421_vm4, %v519_v1, 0.0 }
  0xff   :  { %v482_v63 = vsel %vm421_vm4, %v474_v55, 0.0  ;;  %v520_v14 = vmul.f32 %v401_v5, %v401_v5  ;;  %v523_v23 = vadd.f32 %v522_v9, %v521_v8  ;;  %v503_v28 = vsel %vm421_vm4, %v401_v5, 0.0 }
 0x100   :  { %v484_v2 = vadd.f32 %v483_v62, %v482_v63  ;;  %v504_v30 = vadd.f32 %v503_v28, %v502_v27 }
 0x101   :  { %v524_v25 = vsel %vm421_vm4, %v520_v14, 0.0 }
 0x102   :  { %414 = vrot.lane.b32.xlu1 %v407_v50, %s822_s16  ;;  %v525_v29 = vadd.f32 %v524_v25, %v523_v23 }
 0x106   :  { %447 = vrot.lane.b32.xlu1 %v404_v44, %s822_s16 }
 0x168   :  { %v444_v56 = vpop.permute.xlu0 %443 }
 0x169   :  { %v452_v18 = vsel %vm421_vm4, %v444_v56, 0.0 }
 0x16c   :  { %v446_v59 = vpop.permute.xlu1 %445  ;;  %v417_v60 = vpop.permute.xlu0 %416 }
 0x16d   :  { %v453_v11 = vsel %vm421_vm4, %v446_v59, 0.0  ;;  %v425_v19 = vsel %vm421_vm4, %v417_v60, 0.0 }
 0x16e   :  { %v454_v20 = vadd.f32 %v453_v11, %v452_v18 }
 0x170   :  { %v413_v3 = vpop.permute.xlu1 %412  ;;  %v478_v4 = vpop.permute.xlu0 %477 }
 0x171   :  { %v485_v6 = vsel %vm421_vm4, %v478_v4, 0.0  ;;  %v422_v12 = vsel %vm421_vm4, %v413_v3, 0.0 }
 0x172   :  { %v486_v7 = vadd.f32 %v485_v6, %v484_v2 }
 0x174   :  { %v415_v10 = vpop.permute.xlu1 %414  ;;  %487 = vadd.xlane.f32.xlu0 %v486_v7 }
 0x175   :  { %v423_v13 = vsel %vm421_vm4, %v415_v10, 0.0 }
 0x176   :  { %v424_v15 = vadd.f32 %v423_v13, %v422_v12 }
 0x178   :  { %v448_v21 = vpop.permute.xlu1 %447  ;;  %v426_v22 = vadd.f32 %v425_v19, %v424_v15 }
 0x179   :  { %v455_v24 = vsel %vm421_vm4, %v448_v21, 0.0 }
 0x17a   :  { %427 = vadd.xlane.f32.xlu1 %v426_v22  ;;  %v456_v26 = vadd.f32 %v455_v24, %v454_v20 }
 0x17c   :  { %457 = vadd.xlane.f32.xlu0 %v456_v26 }
 0x17e   :  { %526 = vadd.xlane.f32.xlu1 %v525_v29 }
 0x180   :  { %505 = vadd.xlane.f32.xlu0 %v504_v30 }
 0x201   :  { %v488_v31 = vpop.xlane.xlu0 %487 }
 0x202   :  { %v489_v33 = vrot.slane %v488_v31, 4 }
 0x204   :  { %v490_v34 = vadd.f32 %v489_v33, %v488_v31 }
 0x206   :  { %v491_v37 = vrot.slane %v490_v34, 2 }
 0x207   :  { %v428_v35 = vpop.xlane.xlu1 %427 }
 0x208   :  { %v429_v36 = vrot.slane %v428_v35, 4  ;;  %v492_v46 = vadd.f32 %v491_v37, %v490_v34 }
 0x209   :  { %v458_v38 = vpop.xlane.xlu0 %457 }
 0x20a   :  { %v430_v39 = vadd.f32 %v429_v36, %v428_v35  ;;  %v459_v40 = vrot.slane %v458_v38, 4  ;;  %v493_v55 = vrot.slane %v492_v46, 1 }
 0x20b   :  { %v527_v41 = vpop.xlane.xlu1 %526 }
 0x20c   :  { %v431_v42 = vrot.slane %v430_v39, 2  ;;  %v460_v43 = vadd.f32 %v459_v40, %v458_v38  ;;  %v528_v44 = vrot.slane %v527_v41, 4  ;;  %v494_v62 = vadd.f32 %v493_v55, %v492_v46 }
 0x20d   :  { %v506_v45 = vpop.xlane.xlu0 %505 }
 0x20e   :  { %v461_v47 = vrot.slane %v460_v43, 2  ;;  %v529_v48 = vadd.f32 %v528_v44, %v527_v41  ;;  %v507_v49 = vrot.slane %v506_v45, 4  ;;  %v432_v50 = vadd.f32 %v431_v42, %v430_v39 }
 0x210   :  { %v530_v51 = vrot.slane %v529_v48, 2  ;;  %v508_v52 = vadd.f32 %v507_v49, %v506_v45  ;;  %v433_v53 = vrot.slane %v432_v50, 1  ;;  %v462_v54 = vadd.f32 %v461_v47, %v460_v43 }
 0x212   :  { %v531_v56 = vadd.f32 %v530_v51, %v529_v48  ;;  %v509_v57 = vrot.slane %v508_v52, 2  ;;  %v434_v58 = vadd.f32 %v433_v53, %v432_v50  ;;  %v463_v59 = vrot.slane %v462_v54, 1 }
 0x214   :  { %v510_v60 = vadd.f32 %v509_v57, %v508_v52  ;;  %653 = vpush %v434_v58  ;;  %v464_v61 = vadd.f32 %v463_v59, %v462_v54  ;;  %v532_v63 = vrot.slane %v531_v56, 1 }
 0x216   :  { %655 = vpush %v464_v61  ;;  %v511_v0 = vrot.slane %v510_v60, 1  ;;  %v533_v2 = vadd.f32 %v532_v63, %v531_v56 }
 0x217   :  { %657 = vpush %v494_v62 }
 0x218   :  { %v512_v1 = vadd.f32 %v511_v0, %v510_v60 }
 0x21a   :  { %659 = vpush %v512_v1 }
 0x21b   :  { %661 = vpush %v533_v2 }
 0x245   :  { %s654_s19 = spop %653 }
 0x246   :  { %s436_s21 = sadd.f32 %s654_s19, %s405_s2 }
 0x247   :  { %s656_s23 = spop %655 }
 0x248   :  { %438 = sst [smem:[#allocation5]] %s436_s21  ;;  %v545_v3 = vstv %s436_s21  ;;  %s658_s24 = spop %657 }
 0x249   :  { %v546_v4 = vsel %vm543_vm5, %v545_v3, 0.0  ;;  %s466_s25 = sadd.f32 %s656_s23, %s641_s17 }
 0x24a   :  { %s496_s26 = sadd.f32 %s658_s24, %s642_s18 }
 0x24b   :  { %468 = sst [smem:[#allocation5 + $0x1]] %s466_s25  ;;  %v549_v5 = vstv %s466_s25  ;;  %s660_s0 = spop %659 }
 0x24c   :  { %v550_v6 = vsel %vm547_vm6, %v549_v5, %v546_v4  ;;  %498 = sst [smem:[#allocation5 + $0x2]] %s496_s26  ;;  %v553_v7 = vstv %s496_s26  ;;  %s662_s1 = spop %661 }
 0x24d   :  { %s514_s28 = sadd.f32 %s660_s0, %s643_s20  ;;  %v554_v8 = vsel %vm551_vm7, %v553_v7, %v550_v6 }
 0x24e   :  { %s535_s7 = sadd.f32 %s662_s1, %s644_s22 }
 0x24f   :  { %516 = sst [smem:[#allocation5 + $0x3]] %s514_s28  ;;  %v557_v10 = vstv %s514_s28 }
 0x250   :  { %537 = sst [smem:[#allocation5 + $0x4]] %s535_s7  ;;  %v558_v9 = vsel %vm555_vm8, %v557_v10, %v554_v8  ;;  %v561_v11 = vstv %s535_s7 }
 0x251   :  { %v562_v12 = vsel %vm559_vm9, %v561_v11, %v558_v9 }
 0x252   :  { %563 = vst [vmem:[#allocation9] sm:$0xff] %v562_v12 }
 0x253   :  { %781 = shalt.err (!%p778_p12)
}
 0x254   :  { %s782_s11 = scalar_lea.hbm %s969_s5, 128 }
 0x255   :  { %p783_p13 = scmp.ne.s32.totalorder %s969_s5, %s782_s11  ;;  %p786_p0 = scmp.lt.u32.totalorder %s782_s11, %s969_s5 }
 0x257   :  { %p788_p1 = pnand %p786_p0, %p783_p13 }
 0x259   :  { %791 = shalt.err (!%p788_p1)
}
 0x25a   :  { %573 = dma.vmem_to_hbm [thread:$0]  %s571_s30, 128, %s969_s5, [#allocation10]  }
 0x25b   :  { %806 = dma.done.wait [#allocation10], 128  }
 0x25c   :  { %807 = vsyncadd [#allocation10], 4294967168 }
 0x25d   :  { %577 = vsyncpa [#allocation10], 1 }
 0x25e   :  { %578 = vsyncmov [#allocation4] }
 0x261   :  { %s579_s14 = vpop.sfrf %578 }
 0x262   :  { %p649_p2 = scmp.ne.s32.totalorder %s579_s14, 0 }
 0x264   :  { %583 = shalt.err (%p649_p2)  }
 0x265   :  { %585 = vsyncmov [#allocation4 + $0x1] }
 0x268   :  { %s586_s15 = vpop.sfrf %585 }
 0x269   :  { %p650_p3 = scmp.ne.s32.totalorder %s586_s15, 0 }
 0x26b   :  { %590 = shalt.err (%p650_p3)  }
 0x26c   :  { %592 = vsyncmov [#allocation4 + $0x2] }
 0x26f   :  { %s593_s16 = vpop.sfrf %592 }
 0x270   :  { %p651_p4 = scmp.ne.s32.totalorder %s593_s16, 0 }
 0x272   :  { %597 = shalt.err (%p651_p4)  }
 0x273   :  { %599 = vsyncmov [#allocation4 + $0x3] }
 0x276   :  { %s600_s2 = vpop.sfrf %599 }
 0x277   :  { %p652_p5 = scmp.ne.s32.totalorder %s600_s2, 0 }
 0x279   :  { %604 = shalt.err (%p652_p5)  }

</bundles_post_ra>
